<compile_context>
chip_gen: v6e
topology: v6e:2x2x1
jax: 0.10.0
libtpu: 0.0.40
codegen_flags: <defaults>
</compile_context>

<pallas_src>
import functools

import jax
import jax.numpy as jnp
from jax.experimental import pallas as pl
from jax.experimental.pallas import tpu as pltpu

# Plain Python floats / ints only at module scope: jnp scalars (jax Arrays)
# closed over by the kernel would be captured as constants and rejected by
# pallas_call ("captures constants ... pass them as inputs").
NEG_INF = -1e30
LANE = 128


def _gat_block(x, w_aug, a_src_proj, bias, mask_bias, *, concat, apply_elu):
  """One GATConv layer on values already resident in VMEM (all heads batched)."""
  heads, f_in, f_aug = w_aug.shape
  f_out = f_aug - 1
  n = x.shape[0]

  # One fused MXU pass per layer: projected features + alpha_dst column.
  xb = jnp.broadcast_to(x[None, :, :], (heads, n, f_in))          # [H, N, F_in]
  xw = jnp.einsum("hnf,hfd->hnd", xb, w_aug,
                  preferred_element_type=jnp.float32)             # [H, N, f_out+1]
  xh = xw[:, :, :f_out]                                           # [H, N, f_out]
  alpha_dst = xw[:, :, f_out:]                                    # [H, N, 1]

  # Lane-resident alpha_src row for every head with a single MXU contraction
  # (contract feature axes of both operands -> output [H, N], N on lanes).
  alpha_src = jnp.einsum("hf,nf->hn", a_src_proj, x,
                         preferred_element_type=jnp.float32)[:, None, :]  # [H,1,N]

  e = alpha_dst + alpha_src                                       # [H, N, N]
  e = jnp.where(e > 0.0, e, 0.2 * e)                              # LeakyReLU(0.2)
  e = e + mask_bias[None, :, :]                                   # additive edge mask

  # Row-wise (incoming edges j) numerically-stable softmax.
  m = jnp.max(e, axis=-1, keepdims=True)
  p = jnp.exp(e - m)
  s = jnp.sum(p, axis=-1, keepdims=True)
  attn = p * pl.reciprocal(s, approx=True)                        # EUP slot (free-ish)

  # Aggregate messages on the MXU (batched over heads).
  out = jnp.einsum("hij,hjd->hid", attn, xh,
                   preferred_element_type=jnp.float32)            # [H, N, f_out]

  if concat:
    out = jnp.concatenate([out[h] for h in range(heads)], axis=-1)  # [N, H*f_out]
  else:
    acc = out[0]
    for h in range(1, heads):
      acc = acc + out[h]
    out = acc * (1.0 / heads)                                     # mean over heads

  out = out + bias                                                # [1, D] broadcast
  if apply_elu:
    # min() keeps exp() bounded on the (masked-out) positive branch.
    out = jnp.where(out > 0.0, out, jnp.exp(jnp.minimum(out, 0.0)) - 1.0)
  return out


def cagn_kernel(x_ref, mask_ref, w1_ref, s1_ref, b1_ref, w2_ref, s2_ref,
                b2_ref, w3_ref, s3_ref, b3_ref, o_ref):
  """Fused conv1 -> ELU -> conv2 -> ELU -> conv3; intermediates stay in VMEM."""
  mask_bias = mask_ref[...].astype(jnp.float32)                   # [N, N]
  x = x_ref[...]                                                  # [N, F_in]

  h = _gat_block(x, w1_ref[...], s1_ref[...], b1_ref[...], mask_bias,
                 concat=True, apply_elu=True)                     # [N, H*hid]
  z = _gat_block(h, w2_ref[...], s2_ref[...], b2_ref[...], mask_bias,
                 concat=False, apply_elu=True)                    # [N, hid]
  logits = _gat_block(z, w3_ref[...], s3_ref[...], b3_ref[...], mask_bias,
                      concat=False, apply_elu=False)              # [N, out]

  # Lane-dense store: pad logits up to the full 128-lane output slab.
  n, out_dim = logits.shape
  pad = o_ref.shape[-1] - out_dim
  if pad:
    logits = jnp.concatenate(
        [logits, jnp.zeros((n, pad), jnp.float32)], axis=-1)
  o_ref[...] = logits


def fold_gat_params(w, att_src, att_dst, heads, f_out):
  """Fold attention vectors into the projection, head-major.

  Returns:
    w_aug:      [H, F_in, f_out+1]  -- per-head W with (W_h @ a_dst_h) column
                appended, so x @ w_aug yields x' and alpha_dst in one pass.
    a_src_proj: [H, F_in]           -- W_h @ a_src_h; contracted against x
                in-kernel to give lane-resident alpha_src rows.
  """
  f_in = w.shape[0]
  w_h = jnp.transpose(w.reshape(f_in, heads, f_out), (1, 0, 2))   # [H, F_in, f_out]
  dst_col = jnp.einsum("hfd,hd->hf", w_h, att_dst)[..., None]     # [H, F_in, 1]
  a_src_proj = jnp.einsum("hfd,hd->hf", w_h, att_src)             # [H, F_in]
  w_aug = jnp.concatenate([w_h, dst_col], axis=-1)                # [H, F_in, f_out+1]
  return w_aug, a_src_proj


def cagn_forward(params, x, mask_bias, *, hidden_dim, output_dim, heads):
  n = x.shape[0]
  w1a, s1 = fold_gat_params(params["w1"], params["as1"], params["ad1"],
                            heads, hidden_dim)
  w2a, s2 = fold_gat_params(params["w2"], params["as2"], params["ad2"],
                            1, hidden_dim)
  w3a, s3 = fold_gat_params(params["w3"], params["as3"], params["ad3"],
                            1, output_dim)

  out_pad = ((output_dim + LANE - 1) // LANE) * LANE
  vmem = functools.partial(pl.BlockSpec, memory_space=pltpu.MemorySpace.VMEM)
  padded = pl.pallas_call(
      cagn_kernel,
      out_shape=jax.ShapeDtypeStruct((n, out_pad), jnp.float32),
      in_specs=[vmem()] * 11,
      out_specs=vmem(),
  )(x, mask_bias, w1a, s1, params["b1"], w2a, s2, params["b2"],
    w3a, s3, params["b3"])
  return padded[:, :output_dim]


def init_cagn_params(key, input_dim, hidden_dim, output_dim, heads):
  """Deterministic glorot-ish init matching PyG GATConv parameter shapes."""
  def glorot(k, shape):
    fan_in, fan_out = shape[-2], shape[-1]
    scale = jnp.sqrt(6.0 / (fan_in + fan_out))
    return jax.random.uniform(k, shape, jnp.float32, -scale, scale)

  ks = jax.random.split(key, 9)
  return {
      # conv1: in -> hidden, heads, concat
      "w1": glorot(ks[0], (input_dim, heads * hidden_dim)),
      "as1": glorot(ks[1], (heads, hidden_dim)),
      "ad1": glorot(ks[2], (heads, hidden_dim)),
      "b1": jnp.zeros((1, heads * hidden_dim), jnp.float32),
      # conv2: heads*hidden -> hidden, 1 head, mean
      "w2": glorot(ks[3], (heads * hidden_dim, hidden_dim)),
      "as2": glorot(ks[4], (1, hidden_dim)),
      "ad2": glorot(ks[5], (1, hidden_dim)),
      "b2": jnp.zeros((1, hidden_dim), jnp.float32),
      # conv3: hidden -> output, 1 head, mean
      "w3": glorot(ks[6], (hidden_dim, output_dim)),
      "as3": glorot(ks[7], (1, output_dim)),
      "ad3": glorot(ks[8], (1, output_dim)),
      "b3": jnp.zeros((1, output_dim), jnp.float32),
  }


def build_mask_bias(edge_index, num_nodes):
  """mask[dst, src] = 0 for each edge src->dst (plus self-loops), -1e30 else."""
  adj = jnp.zeros((num_nodes, num_nodes), jnp.float32)
  adj = adj.at[edge_index[1], edge_index[0]].set(1.0)
  adj = adj.at[jnp.arange(num_nodes), jnp.arange(num_nodes)].set(1.0)
  return jnp.where(adj > 0, 0.0, NEG_INF).astype(jnp.bfloat16)


if __name__ == "__main__":
  NUM_NODES = 32
  INPUT_DIM = 16
  HIDDEN_DIM = 8
  OUTPUT_DIM = 4
  HEADS = 2
  NUM_EDGES = 64

  key = jax.random.PRNGKey(0)
  k_x, k_src, k_dst, k_params = jax.random.split(key, 4)

  x = jax.random.normal(k_x, (NUM_NODES, INPUT_DIM), jnp.float32)
  src = jax.random.randint(k_src, (NUM_EDGES,), 0, NUM_NODES, jnp.int32)
  dst = jax.random.randint(k_dst, (NUM_EDGES,), 0, NUM_NODES, jnp.int32)
  edge_index = jnp.stack([src, dst], axis=0)            # [2, E]
  mask_bias = build_mask_bias(edge_index, NUM_NODES)    # [N, N] bf16

  params = init_cagn_params(k_params, INPUT_DIM, HIDDEN_DIM, OUTPUT_DIM, HEADS)

  fwd = jax.jit(functools.partial(cagn_forward, hidden_dim=HIDDEN_DIM,
                                  output_dim=OUTPUT_DIM, heads=HEADS))
  logits = fwd(params, x, mask_bias)
  jax.block_until_ready(logits)

  assert logits.shape == (NUM_NODES, OUTPUT_DIM)
  assert bool(jnp.all(jnp.isfinite(logits)))
  print("KERNEL_OK")
</pallas_src>

<mosaic_0001>
module attributes {stable_mosaic.version = 11 : i64} {
  func.func @cagn_kernel(%arg0: memref<32x16xf32, #tpu.memory_space<vmem>>, %arg1: memref<32x32xbf16, #tpu.memory_space<vmem>>, %arg2: memref<2x16x9xf32, #tpu.memory_space<vmem>>, %arg3: memref<2x16xf32, #tpu.memory_space<vmem>>, %arg4: memref<1x16xf32, #tpu.memory_space<vmem>>, %arg5: memref<1x16x9xf32, #tpu.memory_space<vmem>>, %arg6: memref<1x16xf32, #tpu.memory_space<vmem>>, %arg7: memref<1x8xf32, #tpu.memory_space<vmem>>, %arg8: memref<1x8x5xf32, #tpu.memory_space<vmem>>, %arg9: memref<1x8xf32, #tpu.memory_space<vmem>>, %arg10: memref<1x4xf32, #tpu.memory_space<vmem>>, %arg11: memref<32x128xf32, #tpu.memory_space<vmem>>) attributes {dimension_semantics = [], scalar_prefetch = 0 : i64, scratch_operands = 0 : i64, tpu.core_type = #tpu.core_type<tc>} {
    %c0 = arith.constant 0 : index
    %c0_0 = arith.constant 0 : index
    %0 = vector.load %arg1[%c0, %c0_0] : memref<32x32xbf16, #tpu.memory_space<vmem>>, vector<32x32xbf16>
    %1 = arith.extf %0 : vector<32x32xbf16> to vector<32x32xf32>
    %c0_1 = arith.constant 0 : index
    %c0_2 = arith.constant 0 : index
    %2 = vector.load %arg0[%c0_1, %c0_2] : memref<32x16xf32, #tpu.memory_space<vmem>>, vector<32x16xf32>
    %c0_3 = arith.constant 0 : index
    %c0_4 = arith.constant 0 : index
    %c0_5 = arith.constant 0 : index
    %3 = vector.load %arg2[%c0_3, %c0_4, %c0_5] : memref<2x16x9xf32, #tpu.memory_space<vmem>>, vector<2x16x9xf32>
    %c0_6 = arith.constant 0 : index
    %c0_7 = arith.constant 0 : index
    %4 = vector.load %arg3[%c0_6, %c0_7] : memref<2x16xf32, #tpu.memory_space<vmem>>, vector<2x16xf32>
    %c0_8 = arith.constant 0 : index
    %c0_9 = arith.constant 0 : index
    %5 = vector.load %arg4[%c0_8, %c0_9] : memref<1x16xf32, #tpu.memory_space<vmem>>, vector<1x16xf32>
    %6 = vector.shape_cast %2 : vector<32x16xf32> to vector<1x32x16xf32>
    %7 = vector.shape_cast %6 : vector<1x32x16xf32> to vector<1x32x16xf32>
    %8 = vector.broadcast %7 : vector<1x32x16xf32> to vector<2x32x16xf32>
    "tpu.trace_start"() <{level = 10 : i32, message = "hnf,hfd->hnd"}> : () -> ()
    %cst = arith.constant dense<0.000000e+00> : vector<2x32x9xf32>
    %9 = tpu.matmul %8, %3, %cst {dimension_numbers = #tpu.dot_dimension_numbers<[2], [1], [1], [2], [0, 0, 0, 1, 1, 2], [0], [0]>} : vector<2x32x16xf32>, vector<2x16x9xf32>, vector<2x32x9xf32> -> vector<2x32x9xf32>
    "tpu.trace_stop"() : () -> ()
    %10 = vector.extract_strided_slice %9 {offsets = [0, 0, 0], sizes = [2, 32, 8], strides = [1, 1, 1]} : vector<2x32x9xf32> to vector<2x32x8xf32>
    %11 = vector.extract_strided_slice %9 {offsets = [0, 0, 8], sizes = [2, 32, 1], strides = [1, 1, 1]} : vector<2x32x9xf32> to vector<2x32x1xf32>
    "tpu.trace_start"() <{level = 10 : i32, message = "hf,nf->hn"}> : () -> ()
    %cst_10 = arith.constant dense<0.000000e+00> : vector<2x32xf32>
    %12 = tpu.matmul %4, %2, %cst_10 {dimension_numbers = #tpu.dot_dimension_numbers<[1], [1], [0], [0], [0, 0, 1, 0], [], []>} : vector<2x16xf32>, vector<32x16xf32>, vector<2x32xf32> -> vector<2x32xf32>
    "tpu.trace_stop"() : () -> ()
    %13 = vector.shape_cast %12 : vector<2x32xf32> to vector<2x1x32xf32>
    %14 = vector.broadcast %11 : vector<2x32x1xf32> to vector<2x32x32xf32>
    %15 = vector.broadcast %13 : vector<2x1x32xf32> to vector<2x32x32xf32>
    %16 = arith.addf %14, %15 : vector<2x32x32xf32>
    %cst_11 = arith.constant 0.000000e+00 : f32
    %17 = vector.broadcast %cst_11 : f32 to vector<2x32x32xf32>
    %18 = arith.cmpf ogt, %16, %17 : vector<2x32x32xf32>
    %cst_12 = arith.constant 2.000000e-01 : f32
    %19 = vector.broadcast %cst_12 : f32 to vector<2x32x32xf32>
    %20 = arith.mulf %19, %16 : vector<2x32x32xf32>
    %21 = arith.select %18, %16, %20 : vector<2x32x32xi1>, vector<2x32x32xf32>
    %22 = vector.shape_cast %1 : vector<32x32xf32> to vector<1x32x32xf32>
    %23 = vector.broadcast %22 : vector<1x32x32xf32> to vector<2x32x32xf32>
    %24 = arith.addf %21, %23 : vector<2x32x32xf32>
    %cst_13 = arith.constant dense<0xFF800000> : vector<2x32xf32>
    %25 = vector.multi_reduction <maximumf>, %24, %cst_13 [2] : vector<2x32x32xf32> to vector<2x32xf32>
    %26 = vector.shape_cast %25 : vector<2x32xf32> to vector<2x32x1xf32>
    %27 = vector.broadcast %26 : vector<2x32x1xf32> to vector<2x32x32xf32>
    %28 = arith.subf %24, %27 : vector<2x32x32xf32>
    %29 = math.exp %28 : vector<2x32x32xf32>
    %cst_14 = arith.constant dense<0.000000e+00> : vector<2x32xf32>
    %30 = vector.multi_reduction <add>, %29, %cst_14 [2] : vector<2x32x32xf32> to vector<2x32xf32>
    %31 = vector.shape_cast %30 : vector<2x32xf32> to vector<2x32x1xf32>
    %32 = tpu.reciprocal %31 {approx = true} : vector<2x32x1xf32> -> vector<2x32x1xf32>
    %33 = vector.broadcast %32 : vector<2x32x1xf32> to vector<2x32x32xf32>
    %34 = arith.mulf %29, %33 : vector<2x32x32xf32>
    "tpu.trace_start"() <{level = 10 : i32, message = "hij,hjd->hid"}> : () -> ()
    %cst_15 = arith.constant dense<0.000000e+00> : vector<2x32x8xf32>
    %35 = tpu.matmul %34, %10, %cst_15 {dimension_numbers = #tpu.dot_dimension_numbers<[2], [1], [1], [2], [0, 0, 0, 1, 1, 2], [0], [0]>} : vector<2x32x32xf32>, vector<2x32x8xf32>, vector<2x32x8xf32> -> vector<2x32x8xf32>
    "tpu.trace_stop"() : () -> ()
    %36 = vector.extract_strided_slice %35 {offsets = [0, 0, 0], sizes = [1, 32, 8], strides = [1, 1, 1]} : vector<2x32x8xf32> to vector<1x32x8xf32>
    %37 = vector.shape_cast %36 : vector<1x32x8xf32> to vector<32x8xf32>
    %38 = vector.extract_strided_slice %35 {offsets = [1, 0, 0], sizes = [1, 32, 8], strides = [1, 1, 1]} : vector<2x32x8xf32> to vector<1x32x8xf32>
    %39 = vector.shape_cast %38 : vector<1x32x8xf32> to vector<32x8xf32>
    %40 = tpu.concatenate %37, %39 in 1 : vector<32x8xf32>, vector<32x8xf32> -> vector<32x16xf32>
    %41 = vector.broadcast %5 : vector<1x16xf32> to vector<32x16xf32>
    %42 = arith.addf %40, %41 : vector<32x16xf32>
    %cst_16 = arith.constant 0.000000e+00 : f32
    %43 = vector.broadcast %cst_16 : f32 to vector<32x16xf32>
    %44 = arith.cmpf ogt, %42, %43 : vector<32x16xf32>
    %cst_17 = arith.constant 0.000000e+00 : f32
    %45 = vector.broadcast %cst_17 : f32 to vector<32x16xf32>
    %46 = arith.minimumf %42, %45 : vector<32x16xf32>
    %47 = math.exp %46 : vector<32x16xf32>
    %cst_18 = arith.constant 1.000000e+00 : f32
    %48 = vector.broadcast %cst_18 : f32 to vector<32x16xf32>
    %49 = arith.subf %47, %48 : vector<32x16xf32>
    %50 = arith.select %44, %42, %49 : vector<32x16xi1>, vector<32x16xf32>
    %c0_19 = arith.constant 0 : index
    %c0_20 = arith.constant 0 : index
    %c0_21 = arith.constant 0 : index
    %51 = vector.load %arg5[%c0_19, %c0_20, %c0_21] : memref<1x16x9xf32, #tpu.memory_space<vmem>>, vector<1x16x9xf32>
    %c0_22 = arith.constant 0 : index
    %c0_23 = arith.constant 0 : index
    %52 = vector.load %arg6[%c0_22, %c0_23] : memref<1x16xf32, #tpu.memory_space<vmem>>, vector<1x16xf32>
    %c0_24 = arith.constant 0 : index
    %c0_25 = arith.constant 0 : index
    %53 = vector.load %arg7[%c0_24, %c0_25] : memref<1x8xf32, #tpu.memory_space<vmem>>, vector<1x8xf32>
    %54 = vector.shape_cast %50 : vector<32x16xf32> to vector<1x32x16xf32>
    "tpu.trace_start"() <{level = 10 : i32, message = "hnf,hfd->hnd"}> : () -> ()
    %cst_26 = arith.constant dense<0.000000e+00> : vector<1x32x9xf32>
    %55 = tpu.matmul %54, %51, %cst_26 {dimension_numbers = #tpu.dot_dimension_numbers<[2], [1], [1], [2], [0, 0, 0, 1, 1, 2], [0], [0]>} : vector<1x32x16xf32>, vector<1x16x9xf32>, vector<1x32x9xf32> -> vector<1x32x9xf32>
    "tpu.trace_stop"() : () -> ()
    %56 = vector.extract_strided_slice %55 {offsets = [0, 0, 0], sizes = [1, 32, 8], strides = [1, 1, 1]} : vector<1x32x9xf32> to vector<1x32x8xf32>
    %57 = vector.extract_strided_slice %55 {offsets = [0, 0, 8], sizes = [1, 32, 1], strides = [1, 1, 1]} : vector<1x32x9xf32> to vector<1x32x1xf32>
    "tpu.trace_start"() <{level = 10 : i32, message = "hf,nf->hn"}> : () -> ()
    %cst_27 = arith.constant dense<0.000000e+00> : vector<1x32xf32>
    %58 = tpu.matmul %52, %50, %cst_27 {dimension_numbers = #tpu.dot_dimension_numbers<[1], [1], [0], [0], [0, 0, 1, 0], [], []>} : vector<1x16xf32>, vector<32x16xf32>, vector<1x32xf32> -> vector<1x32xf32>
    "tpu.trace_stop"() : () -> ()
    %59 = vector.shape_cast %58 : vector<1x32xf32> to vector<1x1x32xf32>
    %60 = vector.broadcast %57 : vector<1x32x1xf32> to vector<1x32x32xf32>
    %61 = vector.broadcast %59 : vector<1x1x32xf32> to vector<1x32x32xf32>
    %62 = arith.addf %60, %61 : vector<1x32x32xf32>
    %cst_28 = arith.constant 0.000000e+00 : f32
    %63 = vector.broadcast %cst_28 : f32 to vector<1x32x32xf32>
    %64 = arith.cmpf ogt, %62, %63 : vector<1x32x32xf32>
    %cst_29 = arith.constant 2.000000e-01 : f32
    %65 = vector.broadcast %cst_29 : f32 to vector<1x32x32xf32>
    %66 = arith.mulf %65, %62 : vector<1x32x32xf32>
    %67 = arith.select %64, %62, %66 : vector<1x32x32xi1>, vector<1x32x32xf32>
    %68 = vector.shape_cast %1 : vector<32x32xf32> to vector<1x32x32xf32>
    %69 = arith.addf %67, %68 : vector<1x32x32xf32>
    %cst_30 = arith.constant dense<0xFF800000> : vector<1x32xf32>
    %70 = vector.multi_reduction <maximumf>, %69, %cst_30 [2] : vector<1x32x32xf32> to vector<1x32xf32>
    %71 = vector.shape_cast %70 : vector<1x32xf32> to vector<1x32x1xf32>
    %72 = vector.broadcast %71 : vector<1x32x1xf32> to vector<1x32x32xf32>
    %73 = arith.subf %69, %72 : vector<1x32x32xf32>
    %74 = math.exp %73 : vector<1x32x32xf32>
    %cst_31 = arith.constant dense<0.000000e+00> : vector<1x32xf32>
    %75 = vector.multi_reduction <add>, %74, %cst_31 [2] : vector<1x32x32xf32> to vector<1x32xf32>
    %76 = vector.shape_cast %75 : vector<1x32xf32> to vector<1x32x1xf32>
    %77 = tpu.reciprocal %76 {approx = true} : vector<1x32x1xf32> -> vector<1x32x1xf32>
    %78 = vector.broadcast %77 : vector<1x32x1xf32> to vector<1x32x32xf32>
    %79 = arith.mulf %74, %78 : vector<1x32x32xf32>
    "tpu.trace_start"() <{level = 10 : i32, message = "hij,hjd->hid"}> : () -> ()
    %cst_32 = arith.constant dense<0.000000e+00> : vector<1x32x8xf32>
    %80 = tpu.matmul %79, %56, %cst_32 {dimension_numbers = #tpu.dot_dimension_numbers<[2], [1], [1], [2], [0, 0, 0, 1, 1, 2], [0], [0]>} : vector<1x32x32xf32>, vector<1x32x8xf32>, vector<1x32x8xf32> -> vector<1x32x8xf32>
    "tpu.trace_stop"() : () -> ()
    %81 = vector.shape_cast %80 : vector<1x32x8xf32> to vector<32x8xf32>
    %cst_33 = arith.constant 1.000000e+00 : f32
    %82 = vector.broadcast %cst_33 : f32 to vector<32x8xf32>
    %83 = arith.mulf %81, %82 : vector<32x8xf32>
    %84 = vector.broadcast %53 : vector<1x8xf32> to vector<32x8xf32>
    %85 = arith.addf %83, %84 : vector<32x8xf32>
    %cst_34 = arith.constant 0.000000e+00 : f32
    %86 = vector.broadcast %cst_34 : f32 to vector<32x8xf32>
    %87 = arith.cmpf ogt, %85, %86 : vector<32x8xf32>
    %cst_35 = arith.constant 0.000000e+00 : f32
    %88 = vector.broadcast %cst_35 : f32 to vector<32x8xf32>
    %89 = arith.minimumf %85, %88 : vector<32x8xf32>
    %90 = math.exp %89 : vector<32x8xf32>
    %cst_36 = arith.constant 1.000000e+00 : f32
    %91 = vector.broadcast %cst_36 : f32 to vector<32x8xf32>
    %92 = arith.subf %90, %91 : vector<32x8xf32>
    %93 = arith.select %87, %85, %92 : vector<32x8xi1>, vector<32x8xf32>
    %c0_37 = arith.constant 0 : index
    %c0_38 = arith.constant 0 : index
    %c0_39 = arith.constant 0 : index
    %94 = vector.load %arg8[%c0_37, %c0_38, %c0_39] : memref<1x8x5xf32, #tpu.memory_space<vmem>>, vector<1x8x5xf32>
    %c0_40 = arith.constant 0 : index
    %c0_41 = arith.constant 0 : index
    %95 = vector.load %arg9[%c0_40, %c0_41] : memref<1x8xf32, #tpu.memory_space<vmem>>, vector<1x8xf32>
    %c0_42 = arith.constant 0 : index
    %c0_43 = arith.constant 0 : index
    %96 = vector.load %arg10[%c0_42, %c0_43] : memref<1x4xf32, #tpu.memory_space<vmem>>, vector<1x4xf32>
    %97 = vector.shape_cast %93 : vector<32x8xf32> to vector<1x32x8xf32>
    "tpu.trace_start"() <{level = 10 : i32, message = "hnf,hfd->hnd"}> : () -> ()
    %cst_44 = arith.constant dense<0.000000e+00> : vector<1x32x5xf32>
    %98 = tpu.matmul %97, %94, %cst_44 {dimension_numbers = #tpu.dot_dimension_numbers<[2], [1], [1], [2], [0, 0, 0, 1, 1, 2], [0], [0]>} : vector<1x32x8xf32>, vector<1x8x5xf32>, vector<1x32x5xf32> -> vector<1x32x5xf32>
    "tpu.trace_stop"() : () -> ()
    %99 = vector.extract_strided_slice %98 {offsets = [0, 0, 0], sizes = [1, 32, 4], strides = [1, 1, 1]} : vector<1x32x5xf32> to vector<1x32x4xf32>
    %100 = vector.extract_strided_slice %98 {offsets = [0, 0, 4], sizes = [1, 32, 1], strides = [1, 1, 1]} : vector<1x32x5xf32> to vector<1x32x1xf32>
    "tpu.trace_start"() <{level = 10 : i32, message = "hf,nf->hn"}> : () -> ()
    %cst_45 = arith.constant dense<0.000000e+00> : vector<1x32xf32>
    %101 = tpu.matmul %95, %93, %cst_45 {dimension_numbers = #tpu.dot_dimension_numbers<[1], [1], [0], [0], [0, 0, 1, 0], [], []>} : vector<1x8xf32>, vector<32x8xf32>, vector<1x32xf32> -> vector<1x32xf32>
    "tpu.trace_stop"() : () -> ()
    %102 = vector.shape_cast %101 : vector<1x32xf32> to vector<1x1x32xf32>
    %103 = vector.broadcast %100 : vector<1x32x1xf32> to vector<1x32x32xf32>
    %104 = vector.broadcast %102 : vector<1x1x32xf32> to vector<1x32x32xf32>
    %105 = arith.addf %103, %104 : vector<1x32x32xf32>
    %cst_46 = arith.constant 0.000000e+00 : f32
    %106 = vector.broadcast %cst_46 : f32 to vector<1x32x32xf32>
    %107 = arith.cmpf ogt, %105, %106 : vector<1x32x32xf32>
    %cst_47 = arith.constant 2.000000e-01 : f32
    %108 = vector.broadcast %cst_47 : f32 to vector<1x32x32xf32>
    %109 = arith.mulf %108, %105 : vector<1x32x32xf32>
    %110 = arith.select %107, %105, %109 : vector<1x32x32xi1>, vector<1x32x32xf32>
    %111 = vector.shape_cast %1 : vector<32x32xf32> to vector<1x32x32xf32>
    %112 = arith.addf %110, %111 : vector<1x32x32xf32>
    %cst_48 = arith.constant dense<0xFF800000> : vector<1x32xf32>
    %113 = vector.multi_reduction <maximumf>, %112, %cst_48 [2] : vector<1x32x32xf32> to vector<1x32xf32>
    %114 = vector.shape_cast %113 : vector<1x32xf32> to vector<1x32x1xf32>
    %115 = vector.broadcast %114 : vector<1x32x1xf32> to vector<1x32x32xf32>
    %116 = arith.subf %112, %115 : vector<1x32x32xf32>
    %117 = math.exp %116 : vector<1x32x32xf32>
    %cst_49 = arith.constant dense<0.000000e+00> : vector<1x32xf32>
    %118 = vector.multi_reduction <add>, %117, %cst_49 [2] : vector<1x32x32xf32> to vector<1x32xf32>
    %119 = vector.shape_cast %118 : vector<1x32xf32> to vector<1x32x1xf32>
    %120 = tpu.reciprocal %119 {approx = true} : vector<1x32x1xf32> -> vector<1x32x1xf32>
    %121 = vector.broadcast %120 : vector<1x32x1xf32> to vector<1x32x32xf32>
    %122 = arith.mulf %117, %121 : vector<1x32x32xf32>
    "tpu.trace_start"() <{level = 10 : i32, message = "hij,hjd->hid"}> : () -> ()
    %cst_50 = arith.constant dense<0.000000e+00> : vector<1x32x4xf32>
    %123 = tpu.matmul %122, %99, %cst_50 {dimension_numbers = #tpu.dot_dimension_numbers<[2], [1], [1], [2], [0, 0, 0, 1, 1, 2], [0], [0]>} : vector<1x32x32xf32>, vector<1x32x4xf32>, vector<1x32x4xf32> -> vector<1x32x4xf32>
    "tpu.trace_stop"() : () -> ()
    %124 = vector.shape_cast %123 : vector<1x32x4xf32> to vector<32x4xf32>
    %cst_51 = arith.constant 1.000000e+00 : f32
    %125 = vector.broadcast %cst_51 : f32 to vector<32x4xf32>
    %126 = arith.mulf %124, %125 : vector<32x4xf32>
    %127 = vector.broadcast %96 : vector<1x4xf32> to vector<32x4xf32>
    %128 = arith.addf %126, %127 : vector<32x4xf32>
    %cst_52 = arith.constant 0.000000e+00 : f32
    %129 = vector.broadcast %cst_52 : f32 to vector<32x124xf32>
    %130 = tpu.concatenate %128, %129 in 1 : vector<32x4xf32>, vector<32x124xf32> -> vector<32x128xf32>
    %c0_53 = arith.constant 0 : index
    %c0_54 = arith.constant 0 : index
    %131 = vector.load %arg11[%c0_53, %c0_54] : memref<32x128xf32, #tpu.memory_space<vmem>>, vector<32x128xf32>
    tpu.vector_store %arg11[%c0_53, %c0_54], %130 {strides = array<i32>} : memref<32x128xf32, #tpu.memory_space<vmem>>, vector<32x128xf32>,
    return
  }
}

</mosaic_0001>

<bundles_post_ra>
// kernel: cagn_forward.1
= control target key start
LH: loop header
LB: loop body
LE: loop exit
PB: predicated region body
PF: predicated region fallthrough
CT: control target
= control target key end

     0   :  { %vm56_vm0 = vcmask 130048   ;;  %v1883_v8 = vmov 0.0   ;;  %vm1884_vm1 = vmmov 0   ;;  %v1885_v10 = vmov 8   ;;  %s2169_s2 = inlined_call_operand.vmem [shape: f32[2,16,9], index: 2, kind: input, shape index: {}]   ;;  %s2170_s0 = inlined_call_operand.vmem [shape: f32[32,16], index: 0, kind: input, shape index: {}]   ;;  %s2171_s3 = inlined_call_operand.vmem [shape: f32[2,16], index: 3, kind: input, shape index: {}]   ;;  %s2172_s1 = inlined_call_operand.vmem [shape: bf16[32,32], index: 1, kind: input, shape index: {}]   ;;  %s2173_s5 = inlined_call_operand.vmem [shape: f32[1,16,9], index: 5, kind: input, shape index: {}]   ;;  %s2174_s4 = inlined_call_operand.vmem [shape: f32[1,16], index: 4, kind: input, shape index: {}]   ;;  %s2175_s6 = inlined_call_operand.vmem [shape: f32[1,16], index: 6, kind: input, shape index: {}]   ;;  %s2176_s8 = inlined_call_operand.vmem [shape: f32[1,8,5], index: 8, kind: input, shape index: {}]   ;;  %s2177_s7 = inlined_call_operand.vmem [shape: f32[1,8], index: 7, kind: input, shape index: {}]   ;;  %s2178_s9 = inlined_call_operand.vmem [shape: f32[1,8], index: 9, kind: input, shape index: {}]   ;;  %s2179_s10 = inlined_call_operand.vmem [shape: f32[1,4], index: 10, kind: input, shape index: {}]   ;;  %s2180_s11 = inlined_call_operand.vmem [shape: f32[32,128], index: 11, kind: output, shape index: {}]  }
   0x1   :  { %v51_v0 = vld [vmem:[%s2169_s2 + $0x8] sm:$0xff]  ;;  %v50_v1 = vld [vmem:[%s2169_s2] sm:$0xff]  ;;  %v53_v4 = vld [vmem:[%s2169_s2 + $0x18] sm:$0xff]  ;;  %1799 = vset.pattern.permute.xlu0 %v1885_v10  ;;  %1800 = vset.pattern.permute.xlu1 %v1885_v10  ;;  %v1886_v21 = vmov 1966171168   ;;  %v316_v23 = vlaneseq  ;;  %vm425_vm3 = vcmask 261120  }
   0x2   :  { %v46_v2 = vld [vmem:[%s2170_s0] sm:$0xff]  ;;  %1666 = vmatprep.subr.mxu0 %v51_v0  ;;  %v47_v3 = vld [vmem:[%s2170_s0 + $0x8] sm:$0xff]  ;;  %v52_v5 = vld [vmem:[%s2169_s2 + $0x10] sm:$0xff]  ;;  %1676 = vmatprep.subr.mxu1 %v53_v4  ;;  %v314_v22 = vunpack.c.l.s4 %v1886_v21  ;;  %vm724_vm11 = vcmask 64512  }
   0x3   :  { %1670 = vmatprep.mubr.msk.f32.mxu0 %vm56_vm0, %v46_v2  ;;  %1667 = vmatpush3.msra.mxu0 %v51_v0  ;;  %v48_v6 = vld [vmem:[%s2170_s0 + $0x10] sm:$0xff]  ;;  %v49_v7 = vld [vmem:[%s2170_s0 + $0x18] sm:$0xff]  ;;  %v54_v9 = vld [vmem:[%s2171_s3] sm:$0x3]  ;;  %v317_v25 = vshrl.u32 %v316_v23, 7 }
   0x4   :  { %1680 = vmatprep.mubr.msk.f32.mxu1 %vm56_vm0, %v46_v2  ;;  %1668 = vmatprep.subr.mxu0 %v50_v1  ;;  %v315_v24 = vunpack.c.0.s8 %v314_v22  ;;  %v1588_v32 = vld [vmem:[%s2172_s1] sm:$0xff]   ;;  %v1595_v38 = vld [vmem:[%s2172_s1 + $0x8] sm:$0xff]   ;;  %s1887_s1 = smov 8  }
   0x5   :  { %1669 = vmatpush3.msra.mxu0 %v50_v1  ;;  %1677 = vmatpush3.msra.mxu1 %v53_v4  ;;  %v2008_v29 = vsub.s32 0, %v317_v25  ;;  %v2014_v36 = vunpack.c.l.bf16 %v1588_v32  ;;  %v2021_v46 = vunpack.c.h.bf16 %v1588_v32  ;;  %v2023_v47 = vunpack.c.l.bf16 %v1595_v38 }
   0x6   :  { %1671 = vmatmul.mubr.msk.f32.vlgmr.msra.gmra.mxu0 %vm56_vm0, %v47_v3  ;;  %1678 = vmatprep.subr.mxu1 %v52_v5  ;;  %v318_v26 = vsub.s32 %v315_v24, %v317_v25  ;;  %v2028_v60 = vunpack.c.h.bf16 %v1595_v38 }
   0x7   :  { %1673 = vmatprep.mubr.msk.f32.mxu0 %vm56_vm0, %v48_v6  ;;  %1679 = vmatpush3.msra.mxu1 %v52_v5 }
   0x8   :  { %1681 = vmatmul.mubr.msk.f32.vlgmr.msra.gmra.mxu1 %vm56_vm0, %v47_v3  ;;  %1686 = vmatprep.subr.mxu0 %v1883_v8 }
   0x9   :  { %1683 = vmatprep.mubr.msk.f32.mxu1 %vm56_vm0, %v48_v6  ;;  %1687 = vmatpush3.xpose.msk.msra.mxu0 %vm56_vm0, %v49_v7 }
   0xa   :  { %1674 = vmatmul.mubr.msk.f32.gmra.mxu0 %vm56_vm0, %v49_v7  ;;  %1688 = vmatprep.subr.mxu0 %v1883_v8 }
   0xb   :  { %1694 = vmatprep.mubr.msk.f32.mxu0 %vm1884_vm1, %v1883_v8 }
   0xc   :  { %1684 = vmatmul.mubr.msk.f32.gmra.mxu1 %vm56_vm0, %v49_v7 }
   0xd   :  { %1689 = vmatpush3.xpose.msk.msra.mxu0 %vm56_vm0, %v48_v6 }
   0xe   :  { %1690 = vmatprep.subr.mxu0 %v1883_v8 }
  0x11   :  { %1691 = vmatpush3.xpose.msk.msra.mxu0 %vm56_vm0, %v47_v3 }
  0x12   :  { %1692 = vmatprep.subr.mxu0 %v1883_v8 }
  0x15   :  { %1693 = vmatpush3.xpose.msk.msra.mxu0 %vm56_vm0, %v46_v2 }
  0x18   :  { %1695 = vmatmul.mubr.msk.f32.vlgmr.msra.gmra.mxu0 %vm56_vm0, %v54_v9 }
  0xc6   :  { %v1672_v11 = vpop.f32.mrf.mxu0 }
  0xc8   :  { %v135_v12 = vpop.f32.mrf.mxu0  ;;  %v1995_v13 = vpop.f32.mrf.mxu1 }
  0xc9   :  { %337 = vperm.xlu0 %1799, %v135_v12  }
  0xca   :  { %v1675_v14 = vpop.f32.mrf.mxu0  ;;  %v1997_v15 = vpop.f32.mrf.mxu1 }
  0xcb   :  { %1697 = vmatprep.subr.mxu1 %v1675_v14 }
  0xcc   :  { %v145_v16 = vpop.f32.mrf.mxu0  ;;  %1698 = vmatpush3.msra.mxu1 %v1675_v14  ;;  %v1999_v17 = vpop.f32.mrf.mxu1 }
  0xcd   :  { %342 = vperm.xlu0 %1799, %v1672_v11   ;;  %347 = vperm.xlu1 %1800, %v145_v16  }
  0xce   :  { %1699 = vmatprep.subr.mxu1 %v145_v16  ;;  %v2002_v18 = vpop.f32.mrf.mxu1 }
  0xcf   :  { %1700 = vmatpush3.msra.mxu1 %v145_v16 }
  0xd0   :  { %1701 = vmatprep.subr.mxu1 %v1672_v11 }
  0xd1   :  { %1702 = vmatpush3.msra.mxu1 %v1672_v11  ;;  %357 = vperm.xlu0 %1799, %v1997_v15  }
  0xd2   :  { %352 = vperm.xlu1 %1800, %v1675_v14   ;;  %1703 = vmatprep.subr.mxu1 %v135_v12 }
  0xd3   :  { %1704 = vmatpush3.msra.mxu1 %v135_v12 }
  0xd4   :  { %1711 = vmatprep.subr.mxu1 %v1999_v17 }
  0xd5   :  { %367 = vperm.xlu0 %1799, %v2002_v18  }
  0xd6   :  { %362 = vperm.xlu1 %1800, %v1995_v13  }
  0xd8   :  { %v308_v19 = vpop.f32.mrf.mxu0 }
  0xd9   :  { %v319_v27 = vrot.slane %v308_v19, %v318_v26 }
  0xda   :  { %372 = vperm.xlu1 %1800, %v1999_v17   ;;  %v1696_v20 = vpop.f32.mrf.mxu0 }
  0xdb   :  { %v327_v28 = vrot.slane %v319_v27, %v318_v26  ;;  %v320_v31 = vcombine.high %v319_v27, %v319_v27 }
  0xdd   :  { %v378_v30 = vrot.slane %v327_v28, %v2008_v29  ;;  %v334_v35 = vrot.slane %v320_v31, %v318_v26 }
  0xdf   :  { %v382_v44 = vrot.slane %v334_v35, %v2008_v29 }
 0x144   :  { %v338_v33 = vpop.permute.xlu0 %337 }
 0x145   :  { %v385_v34 = vadd.f32 %v378_v30, %v338_v33 }
 0x147   :  { %vm393_vm2 = vcmp.gt.f32.partialorder %v385_v34, 0.0  ;;  %v401_v37 = vmul.f32 0.2, %v385_v34 }
 0x148   :  { %v343_v39 = vpop.permute.xlu0 %342  ;;  %v348_v40 = vpop.permute.xlu1 %347 }
 0x149   :  { %v386_v41 = vadd.f32 %v378_v30, %v343_v39  ;;  %v387_v42 = vadd.f32 %v378_v30, %v348_v40  ;;  %v409_v43 = vsel %vm393_vm2, %v385_v34, %v401_v37 }
 0x14a   :  { %v417_v45 = vadd.f32 %v2014_v36, %v409_v43 }
 0x14b   :  { %vm394_vm4 = vcmp.gt.f32.partialorder %v386_v41, 0.0  ;;  %v402_v48 = vmul.f32 0.2, %v386_v41  ;;  %vm395_vm5 = vcmp.gt.f32.partialorder %v387_v42, 0.0  ;;  %v403_v49 = vmul.f32 0.2, %v387_v42 }
 0x14c   :  { %v358_v50 = vpop.permute.xlu0 %357  ;;  %v426_v51 = vsel %vm425_vm3, %v417_v45, -inf }
 0x14d   :  { %v389_v52 = vadd.f32 %v382_v44, %v358_v50  ;;  %v353_v53 = vpop.permute.xlu1 %352  ;;  %427 = vmax.xlane.f32.xlu0 %v426_v51  ;;  %v410_v54 = vsel %vm394_vm4, %v386_v41, %v402_v48  ;;  %v411_v55 = vsel %vm395_vm5, %v387_v42, %v403_v49 }
 0x14e   :  { %v388_v56 = vadd.f32 %v378_v30, %v353_v53  ;;  %v418_v57 = vadd.f32 %v2021_v46, %v410_v54  ;;  %v419_v58 = vadd.f32 %v2023_v47, %v411_v55 }
 0x14f   :  { %vm397_vm6 = vcmp.gt.f32.partialorder %v389_v52, 0.0  ;;  %v405_v59 = vmul.f32 0.2, %v389_v52 }
 0x150   :  { %vm396_vm7 = vcmp.gt.f32.partialorder %v388_v56, 0.0  ;;  %v404_v61 = vmul.f32 0.2, %v388_v56  ;;  %v368_v62 = vpop.permute.xlu0 %367  ;;  %v429_v63 = vsel %vm425_vm3, %v418_v57, -inf  ;;  %v432_v0 = vsel %vm425_vm3, %v419_v58, -inf }
 0x151   :  { %v391_v1 = vadd.f32 %v382_v44, %v368_v62  ;;  %v363_v2 = vpop.permute.xlu1 %362  ;;  %430 = vmax.xlane.f32.xlu1 %v429_v63  ;;  %433 = vmax.xlane.f32.xlu0 %v432_v0  ;;  %v413_v3 = vsel %vm397_vm6, %v389_v52, %v405_v59 }
 0x152   :  { %v390_v4 = vadd.f32 %v382_v44, %v363_v2  ;;  %v412_v5 = vsel %vm396_vm7, %v388_v56, %v404_v61  ;;  %v421_v6 = vadd.f32 %v2014_v36, %v413_v3 }
 0x153   :  { %vm399_vm8 = vcmp.gt.f32.partialorder %v391_v1, 0.0  ;;  %v407_v7 = vmul.f32 0.2, %v391_v1  ;;  %v420_v9 = vadd.f32 %v2028_v60, %v412_v5 }
 0x154   :  { %vm398_vm9 = vcmp.gt.f32.partialorder %v390_v4, 0.0  ;;  %v406_v10 = vmul.f32 0.2, %v390_v4  ;;  %v438_v11 = vsel %vm425_vm3, %v421_v6, -inf }
 0x155   :  { %v373_v12 = vpop.permute.xlu1 %372  ;;  %v435_v14 = vsel %vm425_vm3, %v420_v9, -inf  ;;  %439 = vmax.xlane.f32.xlu1 %v438_v11  ;;  %v415_v16 = vsel %vm399_vm8, %v391_v1, %v407_v7 }
 0x156   :  { %v392_v19 = vadd.f32 %v382_v44, %v373_v12  ;;  %436 = vmax.xlane.f32.xlu0 %v435_v14  ;;  %v414_v20 = vsel %vm398_vm9, %v390_v4, %v406_v10  ;;  %v423_v21 = vadd.f32 %v2023_v47, %v415_v16 }
 0x157   :  { %v422_v22 = vadd.f32 %v2021_v46, %v414_v20 }
 0x158   :  { %vm400_vm10 = vcmp.gt.f32.partialorder %v392_v19, 0.0  ;;  %v408_v23 = vmul.f32 0.2, %v392_v19  ;;  %v444_v24 = vsel %vm425_vm3, %v423_v21, -inf }
 0x159   :  { %v441_v25 = vsel %vm425_vm3, %v422_v22, -inf  ;;  %445 = vmax.xlane.f32.xlu1 %v444_v24 }
 0x15a   :  { %442 = vmax.xlane.f32.xlu0 %v441_v25  ;;  %v416_v26 = vsel %vm400_vm10, %v392_v19, %v408_v23 }
 0x15b   :  { %v424_v27 = vadd.f32 %v2028_v60, %v416_v26 }
 0x15d   :  { %v447_v28 = vsel %vm425_vm3, %v424_v27, -inf }
 0x15e   :  { %448 = vmax.xlane.f32.xlu0 %v447_v28 }
 0x1d6   :  { %v428_v30 = vpop.xlane.xlu0 %427 }
 0x1d7   :  { %v450_v31 = vsub.f32 %v417_v45, %v428_v30 }
 0x1d9   :  { %v458_v32 = vmul.f32 1.442695, %v450_v31 }
 0x1da   :  { %v431_v33 = vpop.xlane.xlu1 %430  ;;  %v434_v34 = vpop.xlane.xlu0 %433 }
 0x1db   :  { %1803 = vpow2.f32 %v458_v32  ;;  %v451_v35 = vsub.f32 %v418_v57, %v431_v33  ;;  %v452_v37 = vsub.f32 %v419_v58, %v434_v34 }
 0x1dd   :  { %v460_v38 = vmul.f32 1.442695, %v451_v35  ;;  %v462_v39 = vmul.f32 1.442695, %v452_v37 }
 0x1de   :  { %v440_v40 = vpop.xlane.xlu1 %439 }
 0x1df   :  { %1805 = vpow2.f32 %v460_v38  ;;  %v437_v41 = vpop.xlane.xlu0 %436  ;;  %v454_v42 = vsub.f32 %v421_v6, %v440_v40 }
 0x1e0   :  { %1807 = vpow2.f32 %v462_v39  ;;  %v453_v43 = vsub.f32 %v420_v9, %v437_v41 }
 0x1e1   :  { %v466_v44 = vmul.f32 1.442695, %v454_v42 }
 0x1e2   :  { %v464_v48 = vmul.f32 1.442695, %v453_v43  ;;  %v446_v49 = vpop.xlane.xlu1 %445 }
 0x1e3   :  { %1809 = vpow2.f32 %v466_v44  ;;  %v443_v50 = vpop.xlane.xlu0 %442  ;;  %v456_v45 = vsub.f32 %v423_v21, %v446_v49  ;;  %v763_v49 = vld [vmem:[%s2173_s5] sm:$0xff] }
 0x1e4   :  { %1811 = vpow2.f32 %v464_v48  ;;  %v455_v51 = vsub.f32 %v422_v22, %v443_v50  ;;  %v764_v48 = vld [vmem:[%s2173_s5 + $0x8] sm:$0xff]  ;;  %v1550_v50 = vld [vmem:[%s2174_s4] ss:$0 sm:$0xff] }
 0x1e5   :  { %v470_v52 = vmul.f32 1.442695, %v456_v45  ;;  %1725 = vmatprep.subr.mxu0 %v764_v48 }
 0x1e6   :  { %v468_v53 = vmul.f32 1.442695, %v455_v51  ;;  %1726 = vmatpush3.msra.mxu0 %v764_v48 }
 0x1e7   :  { %1813 = vpow2.f32 %v470_v52  ;;  %v449_v54 = vpop.xlane.xlu0 %448  ;;  %1727 = vmatprep.subr.mxu0 %v763_v49 }
 0x1e8   :  { %v1804_v55 = vpop.eup %1803  ;;  %1815 = vpow2.f32 %v468_v53  ;;  %v457_v56 = vsub.f32 %v424_v27, %v449_v54  ;;  %1728 = vmatpush3.msra.mxu0 %v763_v49 }
 0x1e9   :  { %v474_v57 = vsel %vm425_vm3, %v1804_v55, 0.0 }
 0x1ea   :  { %v472_v58 = vmul.f32 1.442695, %v457_v56  ;;  %475 = vadd.xlane.f32.xlu1 %v474_v57 }
 0x1ec   :  { %v1806_v59 = vpop.eup %1805  ;;  %1817 = vpow2.f32 %v472_v58 }
 0x1ed   :  { %v1808_v61 = vpop.eup %1807  ;;  %v477_v62 = vsel %vm425_vm3, %v1806_v59, 0.0 }
 0x1ee   :  { %478 = vadd.xlane.f32.xlu0 %v477_v62  ;;  %v480_v63 = vsel %vm425_vm3, %v1808_v61, 0.0 }
 0x1ef   :  { %481 = vadd.xlane.f32.xlu1 %v480_v63 }
 0x1f0   :  { %v1810_v0 = vpop.eup %1809 }
 0x1f1   :  { %v1812_v1 = vpop.eup %1811  ;;  %v486_v2 = vsel %vm425_vm3, %v1810_v0, 0.0 }
 0x1f2   :  { %v483_v3 = vsel %vm425_vm3, %v1812_v1, 0.0 }
 0x1f3   :  { %484 = vadd.xlane.f32.xlu0 %v483_v3  ;;  %487 = vadd.xlane.f32.xlu1 %v486_v2 }
 0x1f4   :  { %v1814_v4 = vpop.eup %1813 }
 0x1f5   :  { %v1816_v5 = vpop.eup %1815  ;;  %v492_v6 = vsel %vm425_vm3, %v1814_v4, 0.0 }
 0x1f6   :  { %v489_v7 = vsel %vm425_vm3, %v1816_v5, 0.0 }
 0x1f7   :  { %490 = vadd.xlane.f32.xlu0 %v489_v7  ;;  %493 = vadd.xlane.f32.xlu1 %v492_v6 }
 0x1f9   :  { %v1818_v9 = vpop.eup %1817 }
 0x1fa   :  { %v495_v10 = vsel %vm425_vm3, %v1818_v9, 0.0 }
 0x1fb   :  { %496 = vadd.xlane.f32.xlu0 %v495_v10 }
 0x273   :  { %v476_v11 = vpop.xlane.xlu1 %475 }
 0x274   :  { %1819 = vrcp.f32 %v476_v11 }
 0x277   :  { %v479_v12 = vpop.xlane.xlu0 %478 }
 0x278   :  { %1821 = vrcp.f32 %v479_v12  ;;  %v482_v14 = vpop.xlane.xlu1 %481 }
 0x279   :  { %1823 = vrcp.f32 %v482_v14 }
 0x27c   :  { %v485_v16 = vpop.xlane.xlu0 %484  ;;  %v488_v19 = vpop.xlane.xlu1 %487 }
 0x27d   :  { %1825 = vrcp.f32 %v485_v16 }
 0x27e   :  { %1827 = vrcp.f32 %v488_v19 }
 0x280   :  { %v491_v20 = vpop.xlane.xlu0 %490  ;;  %v494_v21 = vpop.xlane.xlu1 %493 }
 0x281   :  { %v1820_v22 = vpop.eup %1819  ;;  %1829 = vrcp.f32 %v491_v20 }
 0x282   :  { %1831 = vrcp.f32 %v494_v21  ;;  %v506_v23 = vmul.f32 %v1820_v22, %v1804_v55 }
 0x284   :  { %v497_v24 = vpop.xlane.xlu0 %496  ;;  %1705 = vmatprep.mubr.msk.f32.mxu1 %vm425_vm3, %v506_v23 }
 0x285   :  { %v1822_v25 = vpop.eup %1821  ;;  %1833 = vrcp.f32 %v497_v24  ;;  %v765_v24 = vld [vmem:[%s2175_s6] sm:$0x1] }
 0x286   :  { %v1824_v26 = vpop.eup %1823  ;;  %v507_v27 = vmul.f32 %v1822_v25, %v1806_v59 }
 0x287   :  { %v508_v28 = vmul.f32 %v1824_v26, %v1808_v61 }
 0x288   :  { %1706 = vmatmul.mubr.msk.f32.vlgmr.msra.gmra.mxu1 %vm425_vm3, %v507_v27 }
 0x289   :  { %1712 = vmatpush3.msra.mxu1 %v1999_v17  ;;  %1708 = vmatprep.mubr.msk.f32.mxu1 %vm425_vm3, %v508_v28 }
 0x28a   :  { %v1826_v30 = vpop.eup %1825  ;;  %1713 = vmatprep.subr.mxu1 %v2002_v18 }
 0x28b   :  { %v1828_v31 = vpop.eup %1827  ;;  %1714 = vmatpush3.msra.mxu1 %v2002_v18  ;;  %v509_v32 = vmul.f32 %v1826_v30, %v1812_v1 }
 0x28c   :  { %1715 = vmatprep.subr.mxu1 %v1995_v13  ;;  %v510_v33 = vmul.f32 %v1828_v31, %v1810_v0 }
 0x28d   :  { %1709 = vmatmul.mubr.msk.f32.gmra.mxu1 %vm425_vm3, %v509_v32 }
 0x28e   :  { %v1830_v34 = vpop.eup %1829  ;;  %1716 = vmatpush3.msra.mxu1 %v1995_v13  ;;  %1719 = vmatprep.mubr.msk.f32.mxu1 %vm425_vm3, %v510_v33 }
 0x28f   :  { %v1832_v17 = vpop.eup %1831  ;;  %v511_v35 = vmul.f32 %v1830_v34, %v1816_v5  ;;  %1717 = vmatprep.subr.mxu1 %v1997_v15 }
 0x290   :  { %1718 = vmatpush3.msra.mxu1 %v1997_v15  ;;  %v512_v37 = vmul.f32 %v1832_v17, %v1814_v4 }
 0x291   :  { %1720 = vmatmul.mubr.msk.f32.vlgmr.msra.gmra.mxu1 %vm425_vm3, %v511_v35  ;;  %1735 = vmatprep.subr.mxu1 %v1883_v8 }
 0x292   :  { %v1834_v18 = vpop.eup %1833  ;;  %1722 = vmatprep.mubr.msk.f32.mxu1 %vm425_vm3, %v512_v37 }
 0x293   :  { %v513_v38 = vmul.f32 %v1834_v18, %v1818_v9 }
 0x295   :  { %1723 = vmatmul.mubr.msk.f32.gmra.mxu1 %vm425_vm3, %v513_v38 }
 0x296   :  { %1743 = vmatprep.mubr.msk.f32.mxu1 %vm1884_vm1, %v1883_v8 }
 0x348   :  { %v1707_v13 = vpop.f32.mrf.mxu1 }
 0x34a   :  { %v592_v39 = vpop.f32.mrf.mxu1 }
 0x34d   :  { %v1710_v40 = vpop.f32.mrf.mxu1 }
 0x34f   :  { %v602_v41 = vpop.f32.mrf.mxu1 }
 0x351   :  { %v1721_v42 = vpop.f32.mrf.mxu1 }
 0x352   :  { %714 = vrot.lane.b32.xlu0 %v1721_v42, %s1887_s1 }
 0x353   :  { %v689_v15 = vpop.f32.mrf.mxu1 }
 0x354   :  { %712 = vrot.lane.b32.xlu1 %v689_v15, %s1887_s1 }
 0x355   :  { %v1724_v43 = vpop.f32.mrf.mxu1 }
 0x357   :  { %v699_v44 = vpop.f32.mrf.mxu1 }
 0x358   :  { %716 = vrot.lane.b32.xlu1 %v699_v44, %s1887_s1 }
 0x35c   :  { %718 = vrot.lane.b32.xlu1 %v1724_v43, %s1887_s1 }
 0x3c4   :  { %v715_v45 = vpop.permute.xlu0 %714 }
 0x3c5   :  { %v726_v51 = vsel %vm724_vm11, %v1707_v13, %v715_v45 }
 0x3c6   :  { %v736_v52 = vadd.f32 %v1550_v50, %v726_v51  ;;  %v713_v53 = vpop.permute.xlu1 %712 }
 0x3c7   :  { %v725_v54 = vsel %vm724_vm11, %v592_v39, %v713_v53 }
 0x3c8   :  { %v744_v55 = vmin.f32 %v736_v52, 0.0  ;;  %v735_v56 = vadd.f32 %v1550_v50, %v725_v54  ;;  %vm740_vm13 = vcmp.gt.f32.partialorder %v736_v52, 0.0 }
 0x3ca   :  { %v749_v57 = vmul.f32 1.442695, %v744_v55  ;;  %v743_v58 = vmin.f32 %v735_v56, 0.0  ;;  %v717_v59 = vpop.permute.xlu1 %716  ;;  %vm739_vm12 = vcmp.gt.f32.partialorder %v735_v56, 0.0 }
 0x3cb   :  { %v727_v61 = vsel %vm724_vm11, %v602_v41, %v717_v59 }
 0x3cc   :  { %1835 = vpow2.f32 %v749_v57  ;;  %v747_v62 = vmul.f32 1.442695, %v743_v58  ;;  %v737_v63 = vadd.f32 %v1550_v50, %v727_v61 }
 0x3ce   :  { %1837 = vpow2.f32 %v747_v62  ;;  %v745_v0 = vmin.f32 %v737_v63, 0.0  ;;  %v719_v1 = vpop.permute.xlu1 %718  ;;  %vm741_vm14 = vcmp.gt.f32.partialorder %v737_v63, 0.0 }
 0x3cf   :  { %v728_v2 = vsel %vm724_vm11, %v1710_v40, %v719_v1 }
 0x3d0   :  { %v751_v3 = vmul.f32 1.442695, %v745_v0  ;;  %v738_v4 = vadd.f32 %v1550_v50, %v728_v2 }
 0x3d2   :  { %1839 = vpow2.f32 %v751_v3  ;;  %v746_v5 = vmin.f32 %v738_v4, 0.0  ;;  %vm742_vm15 = vcmp.gt.f32.partialorder %v738_v4, 0.0 }
 0x3d4   :  { %v753_v6 = vmul.f32 1.442695, %v746_v5 }
 0x3d6   :  { %1841 = vpow2.f32 %v753_v6 }
 0x3d9   :  { %v1836_v7 = vpop.eup %1835 }
 0x3da   :  { %v1552_v10 = vadd.f32 -1.0, %v1836_v7 }
 0x3db   :  { %v1838_v9 = vpop.eup %1837 }
 0x3dc   :  { %v1551_v11 = vadd.f32 -1.0, %v1838_v9  ;;  %v760_v16 = vsel %vm740_vm13, %v736_v52, %v1552_v10  ;;  %vm1516_vm13 = vcmask 31744  }
 0x3de   :  { %v759_v12 = vsel %vm739_vm12, %v735_v56, %v1551_v11 }
 0x3df   :  { %v1840_v14 = vpop.eup %1839  ;;  %1729 = vmatprep.mubr.msk.f32.mxu0 %vm56_vm0, %v759_v12 }
 0x3e0   :  { %1730 = vmatmul.mubr.msk.f32.vlgmr.msra.gmra.mxu0 %vm56_vm0, %v760_v16  ;;  %v1553_v19 = vadd.f32 -1.0, %v1840_v14 }
 0x3e2   :  { %v761_v20 = vsel %vm741_vm14, %v737_v63, %v1553_v19 }
 0x3e3   :  { %v1842_v21 = vpop.eup %1841  ;;  %1732 = vmatprep.mubr.msk.f32.mxu0 %vm56_vm0, %v761_v20 }
 0x3e4   :  { %v1554_v22 = vadd.f32 -1.0, %v1842_v21 }
 0x3e6   :  { %v762_v23 = vsel %vm742_vm15, %v738_v4, %v1554_v22 }
 0x3e7   :  { %1733 = vmatmul.mubr.msk.f32.gmra.mxu0 %vm56_vm0, %v762_v23  ;;  %1736 = vmatpush3.xpose.msk.msra.mxu1 %vm56_vm0, %v762_v23 }
 0x3e8   :  { %1737 = vmatprep.subr.mxu1 %v1883_v8 }
 0x3eb   :  { %1738 = vmatpush3.xpose.msk.msra.mxu1 %vm56_vm0, %v761_v20 }
 0x3ec   :  { %1739 = vmatprep.subr.mxu1 %v1883_v8 }
 0x3ef   :  { %1740 = vmatpush3.xpose.msk.msra.mxu1 %vm56_vm0, %v760_v16 }
 0x3f0   :  { %1741 = vmatprep.subr.mxu1 %v1883_v8 }
 0x3f3   :  { %1742 = vmatpush3.xpose.msk.msra.mxu1 %vm56_vm0, %v759_v12 }
 0x3f4   :  { %1768 = vmatprep.subr.mxu1 %v1883_v8 }
 0x3f6   :  { %1744 = vmatmul.mubr.msk.f32.vlgmr.msra.gmra.mxu1 %vm56_vm0, %v765_v24 }
 0x3f7   :  { %1776 = vmatprep.mubr.msk.f32.mxu1 %vm1884_vm1, %v1883_v8 }
 0x4a0   :  { %v1731_v25 = vpop.f32.mrf.mxu0 }
 0x4a1   :  { %944 = vperm.xlu1 %1800, %v1731_v25  }
 0x4a2   :  { %v845_v26 = vpop.f32.mrf.mxu0 }
 0x4a3   :  { %939 = vperm.xlu0 %1799, %v845_v26  }
 0x4a7   :  { %v1734_v27 = vpop.f32.mrf.mxu0 }
 0x4a8   :  { %954 = vperm.xlu1 %1800, %v1734_v27   ;;  %1746 = vmatprep.subr.mxu0 %v1734_v27 }
 0x4a9   :  { %v855_v28 = vpop.f32.mrf.mxu0  ;;  %1747 = vmatpush3.msra.mxu0 %v1734_v27 }
 0x4aa   :  { %949 = vperm.xlu0 %1799, %v855_v28   ;;  %1748 = vmatprep.subr.mxu0 %v855_v28 }
 0x4ab   :  { %1749 = vmatpush3.msra.mxu0 %v855_v28 }
 0x4ac   :  { %1750 = vmatprep.subr.mxu0 %v1731_v25 }
 0x4ad   :  { %1751 = vmatpush3.msra.mxu0 %v1731_v25 }
 0x4ae   :  { %1752 = vmatprep.subr.mxu0 %v845_v26 }
 0x4af   :  { %1753 = vmatpush3.msra.mxu0 %v845_v26 }
 0x4b6   :  { %v933_v30 = vpop.f32.mrf.mxu1 }
 0x4b7   :  { %v960_v32 = vrot.slane %v933_v30, %v2008_v29 }
 0x4b8   :  { %v1745_v31 = vpop.f32.mrf.mxu1 }
 0x4b9   :  { %v1152_v31 = vld [vmem:[%s2176_s8] sm:$0xff] }
 0x4ba   :  { %1760 = vmatprep.subr.mxu0 %v1152_v31 }
 0x51c   :  { %v945_v33 = vpop.permute.xlu1 %944 }
 0x51d   :  { %v962_v34 = vadd.f32 %v960_v32, %v945_v33  ;;  %v1564_v33 = vld [vmem:[%s2177_s7] ss:$0 sm:$0xff] }
 0x51e   :  { %v940_v17 = vpop.permute.xlu0 %939 }
 0x51f   :  { %vm966_vm0 = vcmp.gt.f32.partialorder %v962_v34, 0.0  ;;  %v970_v35 = vmul.f32 0.2, %v962_v34  ;;  %v961_v37 = vadd.f32 %v960_v32, %v940_v17 }
 0x521   :  { %vm965_vm1 = vcmp.gt.f32.partialorder %v961_v37, 0.0  ;;  %v969_v18 = vmul.f32 0.2, %v961_v37  ;;  %v974_v38 = vsel %vm966_vm0, %v962_v34, %v970_v35 }
 0x522   :  { %v978_v13 = vadd.f32 %v2021_v46, %v974_v38 }
 0x523   :  { %v955_v39 = vpop.permute.xlu1 %954  ;;  %v973_v40 = vsel %vm965_vm1, %v961_v37, %v969_v18 }
 0x524   :  { %v964_v41 = vadd.f32 %v960_v32, %v955_v39  ;;  %v984_v42 = vsel %vm425_vm3, %v978_v13, -inf  ;;  %v977_v15 = vadd.f32 %v2014_v36, %v973_v40 }
 0x525   :  { %985 = vmax.xlane.f32.xlu1 %v984_v42  ;;  %v950_v43 = vpop.permute.xlu0 %949 }
 0x526   :  { %v972_v44 = vmul.f32 0.2, %v964_v41  ;;  %v963_v48 = vadd.f32 %v960_v32, %v950_v43  ;;  %v981_v49 = vsel %vm425_vm3, %v977_v15, -inf  ;;  %vm968_vm2 = vcmp.gt.f32.partialorder %v964_v41, 0.0 }
 0x527   :  { %982 = vmax.xlane.f32.xlu0 %v981_v49  ;;  %v1888_v32 = vmov 4  }
 0x528   :  { %vm967_vm4 = vcmp.gt.f32.partialorder %v963_v48, 0.0  ;;  %v971_v50 = vmul.f32 0.2, %v963_v48  ;;  %v976_v51 = vsel %vm968_vm2, %v964_v41, %v972_v44  ;;  %1801 = vset.pattern.permute.xlu0 %v1888_v32  ;;  %1802 = vset.pattern.permute.xlu1 %v1888_v32 }
 0x529   :  { %v980_v54 = vadd.f32 %v2028_v60, %v976_v51 }
 0x52a   :  { %v975_v45 = vsel %vm967_vm4, %v963_v48, %v971_v50 }
 0x52b   :  { %v979_v52 = vadd.f32 %v2023_v47, %v975_v45  ;;  %v990_v55 = vsel %vm425_vm3, %v980_v54, -inf }
 0x52d   :  { %v987_v53 = vsel %vm425_vm3, %v979_v52, -inf }
 0x52e   :  { %988 = vmax.xlane.f32.xlu0 %v987_v53 }
 0x532   :  { %991 = vmax.xlane.f32.xlu0 %v990_v55 }
 0x5ae   :  { %v986_v56 = vpop.xlane.xlu1 %985 }
 0x5af   :  { %v994_v57 = vsub.f32 %v978_v13, %v986_v56 }
 0x5b0   :  { %v983_v58 = vpop.xlane.xlu0 %982 }
 0x5b1   :  { %v999_v59 = vmul.f32 1.442695, %v994_v57  ;;  %v993_v61 = vsub.f32 %v977_v15, %v983_v58 }
 0x5b3   :  { %1843 = vpow2.f32 %v999_v59  ;;  %v997_v62 = vmul.f32 1.442695, %v993_v61 }
 0x5b5   :  { %1845 = vpow2.f32 %v997_v62  ;;  %v1153_v62 = vld [vmem:[%s2178_s9] sm:$0x1] }
 0x5b7   :  { %v989_v63 = vpop.xlane.xlu0 %988 }
 0x5b8   :  { %v995_v0 = vsub.f32 %v979_v52, %v989_v63 }
 0x5ba   :  { %v1001_v1 = vmul.f32 1.442695, %v995_v0 }
 0x5bb   :  { %v992_v2 = vpop.xlane.xlu0 %991 }
 0x5bc   :  { %1847 = vpow2.f32 %v1001_v1  ;;  %v996_v3 = vsub.f32 %v980_v54, %v992_v2 }
 0x5be   :  { %v1003_v4 = vmul.f32 1.442695, %v996_v3 }
 0x5c0   :  { %v1844_v5 = vpop.eup %1843  ;;  %1849 = vpow2.f32 %v1003_v4 }
 0x5c1   :  { %v1008_v6 = vsel %vm425_vm3, %v1844_v5, 0.0 }
 0x5c2   :  { %v1846_v7 = vpop.eup %1845  ;;  %1009 = vadd.xlane.f32.xlu0 %v1008_v6 }
 0x5c3   :  { %v1005_v9 = vsel %vm425_vm3, %v1846_v7, 0.0 }
 0x5c4   :  { %1006 = vadd.xlane.f32.xlu1 %v1005_v9 }
 0x5c9   :  { %v1848_v10 = vpop.eup %1847 }
 0x5ca   :  { %v1011_v11 = vsel %vm425_vm3, %v1848_v10, 0.0 }
 0x5cb   :  { %1012 = vadd.xlane.f32.xlu1 %v1011_v11 }
 0x5cd   :  { %v1850_v12 = vpop.eup %1849 }
 0x5ce   :  { %v1014_v14 = vsel %vm425_vm3, %v1850_v12, 0.0 }
 0x5cf   :  { %1015 = vadd.xlane.f32.xlu0 %v1014_v14 }
 0x64b   :  { %v1010_v16 = vpop.xlane.xlu0 %1009 }
 0x64c   :  { %1851 = vrcp.f32 %v1010_v16 }
 0x64d   :  { %v1007_v19 = vpop.xlane.xlu1 %1006 }
 0x64e   :  { %1853 = vrcp.f32 %v1007_v19 }
 0x654   :  { %v1013_v20 = vpop.xlane.xlu1 %1012 }
 0x655   :  { %1855 = vrcp.f32 %v1013_v20 }
 0x658   :  { %v1016_v21 = vpop.xlane.xlu0 %1015 }
 0x659   :  { %1857 = vrcp.f32 %v1016_v21  ;;  %v1852_v22 = vpop.eup %1851 }
 0x65a   :  { %v1022_v25 = vmul.f32 %v1852_v22, %v1844_v5 }
 0x65b   :  { %v1854_v23 = vpop.eup %1853 }
 0x65c   :  { %v1021_v24 = vmul.f32 %v1854_v23, %v1846_v7 }
 0x65e   :  { %1754 = vmatprep.mubr.msk.f32.mxu0 %vm425_vm3, %v1021_v24 }
 0x65f   :  { %1755 = vmatmul.mubr.msk.f32.vlgmr.msra.gmra.mxu0 %vm425_vm3, %v1022_v25 }
 0x660   :  { %1761 = vmatpush3.msra.mxu0 %v1152_v31 }
 0x662   :  { %v1856_v26 = vpop.eup %1855 }
 0x663   :  { %v1023_v27 = vmul.f32 %v1856_v26, %v1848_v10 }
 0x665   :  { %1757 = vmatprep.mubr.msk.f32.mxu0 %vm425_vm3, %v1023_v27 }
 0x666   :  { %v1858_v28 = vpop.eup %1857 }
 0x667   :  { %v1024_v30 = vmul.f32 %v1858_v28, %v1850_v12 }
 0x669   :  { %1758 = vmatmul.mubr.msk.f32.gmra.mxu0 %vm425_vm3, %v1024_v30 }
 0x71f   :  { %v1756_v34 = vpop.f32.mrf.mxu0 }
 0x720   :  { %v1115_v17 = vadd.f32 %v1756_v34, %v1564_v33 }
 0x721   :  { %v1109_v35 = vpop.f32.mrf.mxu0 }
 0x722   :  { %v1133_v37 = vmin.f32 %v1115_v17, 0.0  ;;  %v1110_v18 = vadd.f32 %v1564_v33, %v1109_v35  ;;  %vm1129_vm6 = vcmp.gt.f32.partialorder %v1115_v17, 0.0 }
 0x724   :  { %v1138_v38 = vmul.f32 1.442695, %v1133_v37  ;;  %v1132_v13 = vmin.f32 %v1110_v18, 0.0  ;;  %vm1128_vm5 = vcmp.gt.f32.partialorder %v1110_v18, 0.0 }
 0x726   :  { %1859 = vpow2.f32 %v1138_v38  ;;  %v1136_v39 = vmul.f32 1.442695, %v1132_v13 }
 0x728   :  { %1861 = vpow2.f32 %v1136_v39 }
 0x729   :  { %v1759_v40 = vpop.f32.mrf.mxu0 }
 0x72a   :  { %v1125_v41 = vadd.f32 %v1759_v40, %v1564_v33 }
 0x72b   :  { %v1119_v42 = vpop.f32.mrf.mxu0 }
 0x72c   :  { %v1135_v15 = vmin.f32 %v1125_v41, 0.0  ;;  %v1120_v43 = vadd.f32 %v1564_v33, %v1119_v42  ;;  %vm1131_vm7 = vcmp.gt.f32.partialorder %v1125_v41, 0.0 }
 0x72e   :  { %v1142_v44 = vmul.f32 1.442695, %v1135_v15  ;;  %v1134_v48 = vmin.f32 %v1120_v43, 0.0  ;;  %vm1130_vm8 = vcmp.gt.f32.partialorder %v1120_v43, 0.0 }
 0x730   :  { %1863 = vpow2.f32 %v1142_v44  ;;  %v1140_v49 = vmul.f32 1.442695, %v1134_v48 }
 0x732   :  { %1865 = vpow2.f32 %v1140_v49 }
 0x733   :  { %v1860_v50 = vpop.eup %1859 }
 0x734   :  { %v1570_v51 = vadd.f32 -1.0, %v1860_v50 }
 0x735   :  { %v1862_v45 = vpop.eup %1861 }
 0x736   :  { %v1569_v52 = vadd.f32 -1.0, %v1862_v45  ;;  %v1149_v54 = vsel %vm1129_vm6, %v1115_v17, %v1570_v51 }
 0x738   :  { %v1148_v53 = vsel %vm1128_vm5, %v1110_v18, %v1569_v52 }
 0x739   :  { %1762 = vmatprep.mubr.msk.f32.mxu0 %vm724_vm11, %v1148_v53 }
 0x73a   :  { %1763 = vmatmul.mubr.msk.f32.vlgmr.msra.gmra.mxu0 %vm724_vm11, %v1149_v54 }
 0x73d   :  { %v1864_v55 = vpop.eup %1863 }
 0x73e   :  { %v1572_v56 = vadd.f32 -1.0, %v1864_v55 }
 0x73f   :  { %v1866_v57 = vpop.eup %1865 }
 0x740   :  { %v1151_v58 = vsel %vm1131_vm7, %v1125_v41, %v1572_v56  ;;  %v1571_v59 = vadd.f32 -1.0, %v1866_v57 }
 0x741   :  { %1769 = vmatpush3.xpose.msk.msra.mxu1 %vm724_vm11, %v1151_v58 }
 0x742   :  { %v1150_v61 = vsel %vm1130_vm8, %v1120_v43, %v1571_v59  ;;  %1770 = vmatprep.subr.mxu1 %v1883_v8 }
 0x743   :  { %1765 = vmatprep.mubr.msk.f32.mxu0 %vm724_vm11, %v1150_v61 }
 0x744   :  { %1766 = vmatmul.mubr.msk.f32.gmra.mxu0 %vm724_vm11, %v1151_v58 }
 0x745   :  { %1771 = vmatpush3.xpose.msk.msra.mxu1 %vm724_vm11, %v1150_v61 }
 0x746   :  { %1772 = vmatprep.subr.mxu1 %v1883_v8 }
 0x749   :  { %1773 = vmatpush3.xpose.msk.msra.mxu1 %vm724_vm11, %v1149_v54 }
 0x74a   :  { %1774 = vmatprep.subr.mxu1 %v1883_v8 }
 0x74d   :  { %1775 = vmatpush3.xpose.msk.msra.mxu1 %vm724_vm11, %v1148_v53 }
 0x750   :  { %1777 = vmatmul.mubr.msk.f32.vlgmr.msra.gmra.mxu1 %vm724_vm11, %v1153_v62  ;;  %v1582_v62 = vld [vmem:[%s2179_s10] ss:$0 sm:$0xff] }
 0x7fa   :  { %v1764_v63 = vpop.f32.mrf.mxu0 }
 0x7fb   :  { %1332 = vperm.xlu0 %1801, %v1764_v63  }
 0x7fc   :  { %v1233_v0 = vpop.f32.mrf.mxu0 }
 0x7fd   :  { %1327 = vperm.xlu1 %1802, %v1233_v0  }
 0x804   :  { %v1767_v1 = vpop.f32.mrf.mxu0 }
 0x805   :  { %1779 = vmatprep.subr.mxu0 %v1767_v1 }
 0x806   :  { %v1243_v2 = vpop.f32.mrf.mxu0  ;;  %1780 = vmatpush3.msra.mxu0 %v1767_v1 }
 0x807   :  { %1337 = vperm.xlu1 %1802, %v1243_v2   ;;  %1781 = vmatprep.subr.mxu0 %v1243_v2 }
 0x808   :  { %1782 = vmatpush3.msra.mxu0 %v1243_v2 }
 0x809   :  { %1783 = vmatprep.subr.mxu0 %v1764_v63 }
 0x80a   :  { %1784 = vmatpush3.msra.mxu0 %v1764_v63 }
 0x80b   :  { %1342 = vperm.xlu1 %1802, %v1767_v1   ;;  %1785 = vmatprep.subr.mxu0 %v1233_v0 }
 0x80c   :  { %1786 = vmatpush3.msra.mxu0 %v1233_v0 }
 0x810   :  { %v1321_v8 = vpop.f32.mrf.mxu1 }
 0x811   :  { %v1348_v4 = vrot.slane %v1321_v8, %v2008_v29 }
 0x812   :  { %v1778_v3 = vpop.f32.mrf.mxu1 }
 0x876   :  { %v1333_v5 = vpop.permute.xlu0 %1332 }
 0x877   :  { %v1350_v6 = vadd.f32 %v1348_v4, %v1333_v5 }
 0x878   :  { %v1328_v7 = vpop.permute.xlu1 %1327 }
 0x879   :  { %vm1354_vm9 = vcmp.gt.f32.partialorder %v1350_v6, 0.0  ;;  %v1358_v9 = vmul.f32 0.2, %v1350_v6  ;;  %v1349_v10 = vadd.f32 %v1348_v4, %v1328_v7 }
 0x87b   :  { %vm1353_vm10 = vcmp.gt.f32.partialorder %v1349_v10, 0.0  ;;  %v1357_v11 = vmul.f32 0.2, %v1349_v10  ;;  %v1362_v12 = vsel %vm1354_vm9, %v1350_v6, %v1358_v9 }
 0x87c   :  { %v1366_v14 = vadd.f32 %v2021_v46, %v1362_v12 }
 0x87d   :  { %v1361_v16 = vsel %vm1353_vm10, %v1349_v10, %v1357_v11 }
 0x87e   :  { %v1372_v19 = vsel %vm425_vm3, %v1366_v14, -inf  ;;  %v1365_v20 = vadd.f32 %v2014_v36, %v1361_v16 }
 0x87f   :  { %1373 = vmax.xlane.f32.xlu0 %v1372_v19 }
 0x880   :  { %v1369_v21 = vsel %vm425_vm3, %v1365_v20, -inf }
 0x881   :  { %1370 = vmax.xlane.f32.xlu1 %v1369_v21 }
 0x882   :  { %v1338_v29 = vpop.permute.xlu1 %1337 }
 0x883   :  { %v1351_v22 = vadd.f32 %v1348_v4, %v1338_v29 }
 0x885   :  { %vm1355_vm11 = vcmp.gt.f32.partialorder %v1351_v22, 0.0  ;;  %v1359_v23 = vmul.f32 0.2, %v1351_v22 }
 0x886   :  { %v1343_v24 = vpop.permute.xlu1 %1342 }
 0x887   :  { %v1352_v25 = vadd.f32 %v1348_v4, %v1343_v24  ;;  %v1363_v26 = vsel %vm1355_vm11, %v1351_v22, %v1359_v23 }
 0x888   :  { %v1367_v27 = vadd.f32 %v2023_v47, %v1363_v26 }
 0x889   :  { %vm1356_vm12 = vcmp.gt.f32.partialorder %v1352_v25, 0.0  ;;  %v1360_v46 = vmul.f32 0.2, %v1352_v25 }
 0x88a   :  { %v1375_v28 = vsel %vm425_vm3, %v1367_v27, -inf }
 0x88b   :  { %1376 = vmax.xlane.f32.xlu1 %v1375_v28  ;;  %v1364_v30 = vsel %vm1356_vm12, %v1352_v25, %v1360_v46 }
 0x88c   :  { %v1368_v36 = vadd.f32 %v2028_v60, %v1364_v30 }
 0x88e   :  { %v1378_v31 = vsel %vm425_vm3, %v1368_v36, -inf }
 0x88f   :  { %1379 = vmax.xlane.f32.xlu1 %v1378_v31 }
 0x908   :  { %v1374_v32 = vpop.xlane.xlu0 %1373 }
 0x909   :  { %v1382_v33 = vsub.f32 %v1366_v14, %v1374_v32 }
 0x90a   :  { %v1371_v34 = vpop.xlane.xlu1 %1370 }
 0x90b   :  { %v1387_v17 = vmul.f32 1.442695, %v1382_v33  ;;  %v1381_v35 = vsub.f32 %v1365_v20, %v1371_v34 }
 0x90d   :  { %1867 = vpow2.f32 %v1387_v17  ;;  %v1385_v37 = vmul.f32 1.442695, %v1381_v35 }
 0x90f   :  { %1869 = vpow2.f32 %v1385_v37 }
 0x914   :  { %v1377_v47 = vpop.xlane.xlu1 %1376 }
 0x915   :  { %v1383_v18 = vsub.f32 %v1367_v27, %v1377_v47 }
 0x917   :  { %v1389_v38 = vmul.f32 1.442695, %v1383_v18 }
 0x918   :  { %v1380_v13 = vpop.xlane.xlu1 %1379 }
 0x919   :  { %1871 = vpow2.f32 %v1389_v38  ;;  %v1384_v39 = vsub.f32 %v1368_v36, %v1380_v13 }
 0x91a   :  { %v1868_v40 = vpop.eup %1867 }
 0x91b   :  { %v1391_v41 = vmul.f32 1.442695, %v1384_v39  ;;  %v1396_v60 = vsel %vm425_vm3, %v1868_v40, 0.0 }
 0x91c   :  { %v1870_v42 = vpop.eup %1869  ;;  %1397 = vadd.xlane.f32.xlu1 %v1396_v60 }
 0x91d   :  { %1873 = vpow2.f32 %v1391_v41  ;;  %v1393_v15 = vsel %vm425_vm3, %v1870_v42, 0.0 }
 0x920   :  { %1394 = vadd.xlane.f32.xlu1 %v1393_v15 }
 0x926   :  { %v1872_v43 = vpop.eup %1871 }
 0x927   :  { %v1399_v44 = vsel %vm425_vm3, %v1872_v43, 0.0 }
 0x928   :  { %1400 = vadd.xlane.f32.xlu1 %v1399_v44 }
 0x92a   :  { %v1874_v48 = vpop.eup %1873 }
 0x92b   :  { %v1402_v49 = vsel %vm425_vm3, %v1874_v48, 0.0 }
 0x92c   :  { %1403 = vadd.xlane.f32.xlu0 %v1402_v49 }
 0x9a5   :  { %v1398_v50 = vpop.xlane.xlu1 %1397 }
 0x9a6   :  { %1875 = vrcp.f32 %v1398_v50 }
 0x9a9   :  { %v1395_v45 = vpop.xlane.xlu1 %1394 }
 0x9aa   :  { %1877 = vrcp.f32 %v1395_v45 }
 0x9b1   :  { %v1401_v51 = vpop.xlane.xlu1 %1400 }
 0x9b2   :  { %1879 = vrcp.f32 %v1401_v51 }
 0x9b3   :  { %v1876_v53 = vpop.eup %1875 }
 0x9b4   :  { %v1410_v56 = vmul.f32 %v1876_v53, %v1868_v40 }
 0x9b5   :  { %v1404_v52 = vpop.xlane.xlu0 %1403 }
 0x9b6   :  { %1881 = vrcp.f32 %v1404_v52 }
 0x9b7   :  { %v1878_v54 = vpop.eup %1877 }
 0x9b8   :  { %v1409_v55 = vmul.f32 %v1878_v54, %v1870_v42 }
 0x9ba   :  { %1787 = vmatprep.mubr.msk.f32.mxu0 %vm425_vm3, %v1409_v55 }
 0x9bb   :  { %1788 = vmatmul.mubr.msk.f32.vlgmr.msra.gmra.mxu0 %vm425_vm3, %v1410_v56 }
 0x9bf   :  { %v1880_v57 = vpop.eup %1879 }
 0x9c0   :  { %v1411_v58 = vmul.f32 %v1880_v57, %v1872_v43 }
 0x9c2   :  { %1790 = vmatprep.mubr.msk.f32.mxu0 %vm425_vm3, %v1411_v58 }
 0x9c3   :  { %v1882_v59 = vpop.eup %1881 }
 0x9c4   :  { %v1412_v61 = vmul.f32 %v1882_v59, %v1874_v48 }
 0x9c6   :  { %1791 = vmatmul.mubr.msk.f32.gmra.mxu0 %vm425_vm3, %v1412_v61 }
 0xa7b   :  { %v1789_v63 = vpop.f32.mrf.mxu0 }
 0xa7c   :  { %v1503_v0 = vadd.f32 %v1789_v63, %v1582_v62 }
 0xa7d   :  { %v1497_v1 = vpop.f32.mrf.mxu0 }
 0xa7e   :  { %v1518_v2 = vsel %vm1516_vm13, %v1503_v0, 0.0  ;;  %v1498_v8 = vadd.f32 %v1582_v62, %v1497_v1 }
 0xa7f   :  { %1522 = vst [vmem:[%s2180_s11 + $0x8] sm:$0xff] %v1518_v2 }
 0xa80   :  { %v1517_v3 = vsel %vm1516_vm13, %v1498_v8, 0.0 }
 0xa81   :  { %1521 = vst [vmem:[%s2180_s11] sm:$0xff] %v1517_v3 }
 0xa86   :  { %v1792_v4 = vpop.f32.mrf.mxu0 }
 0xa87   :  { %v1513_v5 = vadd.f32 %v1792_v4, %v1582_v62 }
 0xa88   :  { %v1507_v6 = vpop.f32.mrf.mxu0 }
 0xa89   :  { %v1520_v7 = vsel %vm1516_vm13, %v1513_v5, 0.0  ;;  %v1508_v9 = vadd.f32 %v1582_v62, %v1507_v6 }
 0xa8a   :  { %1524 = vst [vmem:[%s2180_s11 + $0x18] sm:$0xff] %v1520_v7 }
 0xa8b   :  { %v1519_v10 = vsel %vm1516_vm13, %v1508_v9, 0.0 }
 0xa8c   :  { %1523 = vst [vmem:[%s2180_s11 + $0x10] sm:$0xff] %v1519_v10 }

</bundles_post_ra>
